<compile_context>
chip_gen: v7x
topology: tpu7x:2x2x1
jax: 0.10.0
libtpu: 0.0.40
codegen_flags: <defaults>
</compile_context>

<pallas_src>
import functools

import jax
import jax.numpy as jnp
from jax.experimental import pallas as pl
from jax.experimental.pallas import tpu as pltpu


def _dropout_kernel(x_ref, r_ref, o_ref, *, threshold, inv_keep):
    # keep element iff its uniform uint32 draw is below keep_prob * 2^32
    keep = r_ref[...] < jnp.uint32(threshold)
    scaled = x_ref[...] * jnp.asarray(inv_keep, dtype=x_ref.dtype)
    o_ref[...] = jnp.where(keep, scaled, jnp.zeros((), o_ref.dtype)).astype(o_ref.dtype)


def _pick_block_rows(n_rows, n_cols, itemsize, target_bytes=4 << 20):
    """Largest row-block (multiple of 8, or full N) with ~target_bytes per operand."""
    rows = target_bytes // max(1, n_cols * itemsize)
    if rows >= n_rows:
        return n_rows
    rows = max(8, (rows // 8) * 8)
    return min(rows, n_rows)


def dropout_forward(x, seed, dropout=0.5, training=True, block_rows=None):
    """Forward pass of the custom Dropout module. x: [N, C] float32."""
    if not training or dropout <= 0.0:
        return x
    if dropout >= 1.0:
        # keep_prob == 0: everything is dropped (avoid divide-by-zero scale).
        return jnp.zeros_like(x)

    keep_prob = 1.0 - float(dropout)
    inv_keep = 1.0 / keep_prob
    threshold = min(int(round(keep_prob * (1 << 32))), (1 << 32) - 1)

    N, C = x.shape
    if block_rows is None:
        block_rows = _pick_block_rows(N, C, x.dtype.itemsize)
    grid = (pl.cdiv(N, block_rows),)

    # Tile-invariant random stream (counter-based), one uint32 per element.
    rbits = jax.random.bits(jax.random.PRNGKey(seed), (N, C), dtype=jnp.uint32)

    kernel = functools.partial(_dropout_kernel, threshold=threshold, inv_keep=inv_keep)

    return pl.pallas_call(
        kernel,
        out_shape=jax.ShapeDtypeStruct((N, C), x.dtype),
        grid=grid,
        in_specs=[
            pl.BlockSpec((block_rows, C), lambda i: (i, 0)),
            pl.BlockSpec((block_rows, C), lambda i: (i, 0)),
        ],
        out_specs=pl.BlockSpec((block_rows, C), lambda i: (i, 0)),
        compiler_params=pltpu.CompilerParams(
            dimension_semantics=("parallel",),
            vmem_limit_bytes=64 * 1024 * 1024,
        ),
    )(x, rbits)


if __name__ == "__main__":
    key = jax.random.PRNGKey(0)
    N, C = 16, 256  # small [N, C] input; fits in a single lane-dense block
    x = jax.random.normal(key, (N, C), dtype=jnp.float32)

    out = dropout_forward(x, seed=1234, dropout=0.5, training=True)
    out = jax.block_until_ready(out)

    # Sanity checks on the dropout semantics.
    keep_prob = 0.5
    mask = (out != 0.0)
    # Kept entries must equal x / keep_prob exactly.
    kept_ok = bool(jnp.allclose(jnp.where(mask, out, 0.0),
                                jnp.where(mask, x / keep_prob, 0.0),
                                rtol=1e-6, atol=1e-6))
    # Roughly keep_prob fraction of entries survive.
    frac = float(jnp.mean(mask.astype(jnp.float32)))
    frac_ok = abs(frac - keep_prob) < 0.1

    # Eval mode is identity.
    eval_out = dropout_forward(x, seed=1234, dropout=0.5, training=False)
    eval_ok = bool(jnp.array_equal(eval_out, x))

    assert out.shape == x.shape and out.dtype == x.dtype
    assert kept_ok and frac_ok and eval_ok

    print("KERNEL_OK")
</pallas_src>

<mosaic_0001>
module attributes {stable_mosaic.version = 11 : i64} {
  func.func @_dropout_kernel(%arg0: i32, %arg1: memref<16x256xf32, #tpu.memory_space<vmem>>, %arg2: memref<16x256xi32, #tpu.memory_space<vmem>>, %arg3: memref<16x256xf32, #tpu.memory_space<vmem>>) attributes {dimension_semantics = [#tpu.dimension_semantics<parallel>], iteration_bounds = array<i64: 1>, scalar_prefetch = 0 : i64, scratch_operands = 0 : i64, tpu.core_type = #tpu.core_type<tc>, window_params = [{transform_indices = @transform_0, window_bounds = array<i64: 16, 256>}, {transform_indices = @transform_1, window_bounds = array<i64: 16, 256>}, {transform_indices = @transform_2, window_bounds = array<i64: 16, 256>}]} {
    %c0 = arith.constant 0 : index
    %c0_0 = arith.constant 0 : index
    %0 = vector.load %arg2[%c0, %c0_0] : memref<16x256xi32, #tpu.memory_space<vmem>>, vector<16x256xi32>
    %c-2147483648_i32 = arith.constant -2147483648 : i32
    %1 = vector.broadcast %c-2147483648_i32 : i32 to vector<16x256xi32>
    %2 = arith.cmpi ult, %0, %1 : vector<16x256xi32>
    %c0_1 = arith.constant 0 : index
    %c0_2 = arith.constant 0 : index
    %3 = vector.load %arg1[%c0_1, %c0_2] : memref<16x256xf32, #tpu.memory_space<vmem>>, vector<16x256xf32>
    %cst = arith.constant 2.000000e+00 : f32
    %4 = vector.broadcast %cst : f32 to vector<16x256xf32>
    %5 = arith.mulf %3, %4 : vector<16x256xf32>
    %cst_3 = arith.constant 0.000000e+00 : f32
    %6 = vector.broadcast %cst_3 : f32 to vector<16x256xf32>
    %7 = arith.select %2, %5, %6 : vector<16x256xi1>, vector<16x256xf32>
    %c0_4 = arith.constant 0 : index
    %c0_5 = arith.constant 0 : index
    %8 = vector.load %arg3[%c0_4, %c0_5] : memref<16x256xf32, #tpu.memory_space<vmem>>, vector<16x256xf32>
    tpu.vector_store %arg3[%c0_4, %c0_5], %7 {strides = array<i32>} : memref<16x256xf32, #tpu.memory_space<vmem>>, vector<16x256xf32>,
    return
  }
  func.func @transform_0(%arg0: i32) -> (i32, i32) {
    %c0_i32 = arith.constant 0 : i32
    %c0_i32_0 = arith.constant 0 : i32
    return %arg0, %c0_i32 : i32, i32
  }
  func.func @transform_1(%arg0: i32) -> (i32, i32) {
    %c0_i32 = arith.constant 0 : i32
    %c0_i32_0 = arith.constant 0 : i32
    return %arg0, %c0_i32 : i32, i32
  }
  func.func @transform_2(%arg0: i32) -> (i32, i32) {
    %c0_i32 = arith.constant 0 : i32
    %c0_i32_0 = arith.constant 0 : i32
    return %arg0, %c0_i32 : i32, i32
  }
}

</mosaic_0001>

<bundles_post_ra>
// kernel: tpu_custom_call.1
= control target key start
LH: loop header
LB: loop body
LE: loop exit
PB: predicated region body
PF: predicated region fallthrough
CT: control target
= control target key end

     0   :  { %7 = vsyncpa [#allocation3], 0  ;;  %s224_s0 = inlined_call_operand.hbm [shape: f32[16,256], index: 0, kind: input, shape index: {}]   ;;  %s225_s1 = inlined_call_operand.hbm [shape: u32[16,256], index: 1, kind: input, shape index: {}]   ;;  %s226_s2 = inlined_call_operand.hbm [shape: f32[16,256], index: 2, kind: output, shape index: {}]  }
   0x1   :  { %8 = vsyncpa [#allocation6], 0 }
   0x2   :  { %9 = vsyncpa [#allocation4], 0  ;;  %s159_s9 = smov [#allocation2]   ;;  %s87_s13 = scalar_lea.hbm %s224_s0, 512 }
   0x3   :  { %s15_s10 = sshll.u32 %s159_s9, 4  ;;  %p88_p0 = scmp.ne.s32.totalorder %s224_s0, %s87_s13  ;;  %s16_s10 = int_to_ptr.vmem [resolvable:$true] %s15_s10 }
   0x4   :  { %p91_p1 = scmp.lt.u32.totalorder %s87_s13, %s224_s0 }
   0x6   :  { %p93_p2 = pnand %p91_p1, %p88_p0 }
   0x8   :  { %96 = shalt.err (!%p93_p2)
}
   0x9   :  { %s97_s18 = scalar_lea.vmem %s16_s10, 512  ;;  %p102_p4 = scmp.lt.s32.totalorder %s16_s10, %s16_s10 }
   0xa   :  { %p98_p3 = scmp.ne.s32.totalorder %s16_s10, %s97_s18  ;;  %p103_p5 = scmp.lt.s32.totalorder %s97_s18, %s97_s18 }
   0xc   :  { %p104_p6 = por %p103_p5, %p102_p4 }
   0xe   :  { %p105_p7 = pnand %p104_p6, %p98_p3 }
  0x10   :  { %108 = shalt.err (!%p105_p7)
}
  0x11   :  { %s160_s19 = smov 256   ;;  %s161_s20 = smov 16  }
  0x12   :  { %21 = dma.hbm_to_vmem [thread:$0]  %s224_s0, 512, %s16_s10, [#allocation3], %s160_s19, %s160_s19, %s161_s20  }
  0x13   :  { %s162_s23 = smov [#allocation5]   ;;  %s109_s27 = scalar_lea.hbm %s225_s1, 512 }
  0x14   :  { %s27_s24 = sshll.u32 %s162_s23, 4  ;;  %p110_p8 = scmp.ne.s32.totalorder %s225_s1, %s109_s27  ;;  %s28_s24 = int_to_ptr.vmem [resolvable:$true] %s27_s24 }
  0x15   :  { %p113_p9 = scmp.lt.u32.totalorder %s109_s27, %s225_s1 }
  0x17   :  { %p115_p10 = pnand %p113_p9, %p110_p8 }
  0x19   :  { %118 = shalt.err (!%p115_p10)
}
  0x1a   :  { %s119_s4 = scalar_lea.vmem %s28_s24, 512  ;;  %p124_p12 = scmp.lt.s32.totalorder %s28_s24, %s28_s24 }
  0x1b   :  { %p120_p11 = scmp.ne.s32.totalorder %s28_s24, %s119_s4  ;;  %p125_p13 = scmp.lt.s32.totalorder %s119_s4, %s119_s4 }
  0x1d   :  { %p126_p0 = por %p125_p13, %p124_p12 }
  0x1f   :  { %p127_p1 = pnand %p126_p0, %p120_p11 }
  0x21   :  { %130 = shalt.err (!%p127_p1)
}
  0x22   :  { %33 = dma.hbm_to_vmem [thread:$0]  %s225_s1, 512, %s28_s24, [#allocation6], %s160_s19, %s160_s19, %s161_s20  }
  0x23   :  { %153 = dma.done.wait [#allocation3], 512  }
  0x24   :  { %154 = vsyncadd [#allocation3], 4294966784 }
  0x25   :  { %155 = dma.done.wait [#allocation6], 512  }
  0x26   :  { %156 = vsyncadd [#allocation6], 4294966784  ;;  %v40_v0 = vld [vmem:[#allocation5] sm:$0xff]  ;;  %v41_v2 = vld [vmem:[#allocation5 + $0x8] sm:$0xff]  ;;  %s163_s6 = smov [#allocation7]  }
  0x27   :  { %v48_v1 = vld [vmem:[#allocation2] sm:$0xff]  ;;  %s69_s7 = sshll.u32 %s163_s6, 4  ;;  %vm44_vm0 = vcmp.lt.u32.totalorder %v40_v0, 2147483648  ;;  %vm45_vm1 = vcmp.lt.u32.totalorder %v41_v2, 2147483648  ;;  %v49_v4 = vld [vmem:[#allocation2 + $0x8] sm:$0xff]  ;;  %v42_v5 = vld [vmem:[#allocation5 + $0x10] sm:$0xff]  ;;  %s70_s7 = int_to_ptr.vmem [resolvable:$true] %s69_s7 }
  0x28   :  { %v52_v3 = vmul.f32 2.0, %v48_v1  ;;  %v50_v6 = vld [vmem:[#allocation2 + $0x10] sm:$0xff]  ;;  %v53_v7 = vmul.f32 2.0, %v49_v4  ;;  %vm46_vm2 = vcmp.lt.u32.totalorder %v42_v5, 2147483648  ;;  %v43_v9 = vld [vmem:[#allocation5 + $0x18] sm:$0xff]  ;;  %s131_s1 = scalar_lea.vmem %s70_s7, 512  ;;  %p136_p3 = scmp.lt.s32.totalorder %s70_s7, %s70_s7 }
  0x29   :  { %v54_v8 = vmul.f32 2.0, %v50_v6  ;;  %v51_v10 = vld [vmem:[#allocation2 + $0x18] sm:$0xff]  ;;  %vm47_vm3 = vcmp.lt.u32.totalorder %v43_v9, 2147483648  ;;  %p132_p2 = scmp.ne.s32.totalorder %s70_s7, %s131_s1  ;;  %p137_p4 = scmp.lt.s32.totalorder %s131_s1, %s131_s1 }
  0x2a   :  { %v56_v11 = vsel %vm44_vm0, %v52_v3, 0.0  ;;  %v55_v12 = vmul.f32 2.0, %v51_v10  ;;  %v57_v13 = vsel %vm45_vm1, %v53_v7, 0.0 }
  0x2b   :  { %60 = vst [vmem:[#allocation7] sm:$0xff] %v56_v11  ;;  %v58_v14 = vsel %vm46_vm2, %v54_v8, 0.0  ;;  %61 = vst [vmem:[#allocation7 + $0x8] sm:$0xff] %v57_v13  ;;  %p138_p5 = por %p137_p4, %p136_p3 }
  0x2c   :  { %62 = vst [vmem:[#allocation7 + $0x10] sm:$0xff] %v58_v14  ;;  %v59_v15 = vsel %vm47_vm3, %v55_v12, 0.0 }
  0x2d   :  { %63 = vst [vmem:[#allocation7 + $0x18] sm:$0xff] %v59_v15  ;;  %p139_p6 = pnand %p138_p5, %p132_p2 }
  0x2f   :  { %142 = shalt.err (!%p139_p6)
}
  0x30   :  { %s143_s10 = scalar_lea.hbm %s226_s2, 512 }
  0x31   :  { %p144_p7 = scmp.ne.s32.totalorder %s226_s2, %s143_s10  ;;  %p147_p8 = scmp.lt.u32.totalorder %s143_s10, %s226_s2 }
  0x33   :  { %p149_p9 = pnand %p147_p8, %p144_p7 }
  0x35   :  { %152 = shalt.err (!%p149_p9)
}
  0x36   :  { %75 = dma.vmem_to_hbm [thread:$0]  %s70_s7, 512, %s226_s2, [#allocation4], %s160_s19, %s160_s19, %s161_s20  }
  0x37   :  { %157 = dma.done.wait [#allocation4], 512  }
  0x38   :  { %158 = vsyncadd [#allocation4], 4294966784 }
  0x39   :  { %79 = vsyncpa [#allocation3], 1 }
  0x3a   :  { %80 = vsyncpa [#allocation6], 1 }
  0x3b   :  { %81 = vsyncpa [#allocation4], 1 }

</bundles_post_ra>
